<compile_context>
chip_gen: v7x
topology: tpu7x:2x2x1
jax: 0.10.0
libtpu: 0.0.40
codegen_flags: <defaults>
</compile_context>

<pallas_src>
import math

import jax
import jax.numpy as jnp
from jax.experimental import pallas as pl
from jax.experimental.pallas import tpu as pltpu


def attention_kernel(enc_ref, hid_ref, w1e_ref, w1h_ref, b1_ref, w2_ref, out_ref):
    """One grid step handles TB batch rows.

    enc_ref: (TB, S, D)  encoder outputs tile
    hid_ref: (TB, D)     decoder hidden states tile
    w1e_ref: (D, D)      linear1 weight, encoder half (pre-transposed)
    w1h_ref: (D, D)      linear1 weight, hidden half  (pre-transposed)
    b1_ref : (1, D)      linear1 bias
    w2_ref : (1, D)      linear2 weight row (no bias)
    out_ref: (TB, D)     context vectors
    """
    TB, S, D = enc_ref.shape
    enc = enc_ref[...]                                                        # (TB, S, D)

    # --- linear1 + tanh: fuse all TB*S rows into one MXU matmul -----------------------
    enc2 = enc.reshape(TB * S, D)
    pre = jnp.dot(enc2, w1e_ref[...], preferred_element_type=jnp.float32)     # (TB*S, D)
    # Fold the bias into the per-batch-row hidden projection (TB*D adds, not TB*S*D).
    hproj = jnp.dot(hid_ref[...], w1h_ref[...],
                    preferred_element_type=jnp.float32) + b1_ref[...]         # (TB, D)
    pre3 = pre.reshape(TB, S, D) + hproj[:, None, :]                          # (TB, S, D)
    h1 = jnp.tanh(pre3)

    # --- linear2 scores, lane-major (VPU mul + XLU lane-reduce; no N=1 MXU matmul) ----
    e = jnp.sum(h1 * w2_ref[...], axis=-1)                                    # (TB, S)

    # --- softmax over the sequence axis (lane axis) ------------------------------------
    m = jnp.max(e, axis=-1, keepdims=True)                                    # (TB, 1)
    p = jnp.exp(e - m)                                                        # (TB, S)
    denom = jnp.sum(p, axis=-1, keepdims=True)                                # (TB, 1)
    # Exact reciprocal keeps the 1e-5 match vs the reference; flip to approx=True
    # (EUP vrcp, effectively free) if ~1e-4 relative tolerance is acceptable.
    inv = pl.reciprocal(denom, approx=False)                                  # (TB, 1)

    # --- context: batched (1,S)@(S,D) on the MXU, then normalize ------------------------
    ctx = jnp.einsum("bqs,bsd->bqd", p[:, None, :], enc,
                     preferred_element_type=jnp.float32)[:, 0, :]             # (TB, D)
    out_ref[...] = (ctx * inv).astype(out_ref.dtype)


def prepare_attention_params(w1, b1, w2):
    """One-time parameter prep (hoisted out of the per-call path).

    w1: [D, 2D] (torch linear1.weight), b1: [D], w2: [1, D] (torch linear2.weight).
    """
    D = w1.shape[0]
    w1e = jnp.asarray(w1[:, :D].T)        # (D, D): multiplies the encoder half
    w1h = jnp.asarray(w1[:, D:].T)        # (D, D): multiplies the hidden half
    b1r = jnp.asarray(b1).reshape(1, D)
    w2r = jnp.asarray(w2).reshape(1, D)   # row layout -> no (D, 1) one-lane block
    return w1e, w1h, b1r, w2r


def _pick_batch_tile(B, S):
    """Pick TB so each grid step feeds >= ~512 fused rows (TB*S) to the MXU, or the
    whole batch if it is smaller, respecting the sublane (8) divisibility rule."""
    target_rows = 512
    tb = max(1, -(-target_rows // S))          # cdiv(target_rows, S)
    if tb >= B:
        return B, B                            # single grid step, block = full batch
    tb = max(8, (tb // 8) * 8)                 # multiple of 8 for non-full blocks
    b_padded = -(-B // tb) * tb
    return tb, b_padded


def attention_pallas(hidden_state, encoder_outputs, w1e, w1h, b1r, w2r):
    """hidden_state: [B, D], encoder_outputs: [B, S, D]. Weights from
    prepare_attention_params(). Returns context vectors [B, D]."""
    B, S, D = encoder_outputs.shape
    tb, b_padded = _pick_batch_tile(B, S)
    if b_padded != B:
        pad = b_padded - B
        # Padded rows produce a uniform softmax over zero encoder rows -> zero context;
        # they are sliced off below, so no NaNs and no semantic change.
        encoder_outputs = jnp.pad(encoder_outputs, ((0, pad), (0, 0), (0, 0)))
        hidden_state = jnp.pad(hidden_state, ((0, pad), (0, 0)))

    out = pl.pallas_call(
        attention_kernel,
        out_shape=jax.ShapeDtypeStruct((b_padded, D), encoder_outputs.dtype),
        grid=(b_padded // tb,),
        in_specs=[
            pl.BlockSpec((tb, S, D), lambda b: (b, 0, 0)),   # encoder_outputs tile
            pl.BlockSpec((tb, D), lambda b: (b, 0)),         # hidden_state tile
            pl.BlockSpec((D, D), lambda b: (0, 0)),          # w1e (resident)
            pl.BlockSpec((D, D), lambda b: (0, 0)),          # w1h (resident)
            pl.BlockSpec((1, D), lambda b: (0, 0)),          # b1
            pl.BlockSpec((1, D), lambda b: (0, 0)),          # w2 row
        ],
        out_specs=pl.BlockSpec((tb, D), lambda b: (b, 0)),   # lane-dense 2-D output slab
        compiler_params=pltpu.CompilerParams(
            dimension_semantics=("parallel",)),
    )(encoder_outputs, hidden_state, w1e, w1h, b1r, w2r)
    return out[:B]


def attention_ref(hidden_state, encoder_outputs, w1, b1, w2):
    """Pure-JAX reference mirroring the PyTorch forward exactly."""
    B, S, D = encoder_outputs.shape
    hid = jnp.repeat(hidden_state[:, None, :], S, axis=1)           # [B, S, D]
    inputs = jnp.concatenate([encoder_outputs, hid], axis=2)        # [B, S, 2D]
    h1 = jnp.tanh(inputs @ w1.T + b1)                               # [B, S, D]
    e = (h1 @ w2.T)[..., 0]                                         # [B, S]
    alpha = jax.nn.softmax(e, axis=1)
    context = jnp.einsum("bs,bsd->bd", alpha, encoder_outputs)
    return context


if __name__ == "__main__":
    B, S, D = 2, 8, 32
    key = jax.random.PRNGKey(0)
    k_h, k_enc, k_w1, k_w2 = jax.random.split(key, 4)

    hidden_state = jax.random.normal(k_h, (B, D), dtype=jnp.float32)
    encoder_outputs = jax.random.normal(k_enc, (B, S, D), dtype=jnp.float32)

    # Deterministic xavier_normal init (fan_in + fan_out), zero bias — matches __init__.
    std1 = math.sqrt(2.0 / (2 * D + D))
    w1 = std1 * jax.random.normal(k_w1, (D, 2 * D), dtype=jnp.float32)   # linear1.weight
    b1 = jnp.zeros((D,), dtype=jnp.float32)                              # linear1.bias
    std2 = math.sqrt(2.0 / (D + 1))
    w2 = std2 * jax.random.normal(k_w2, (1, D), dtype=jnp.float32)       # linear2.weight

    # One-time weight prep (hoisted out of the forward path).
    w1e, w1h, b1r, w2r = prepare_attention_params(w1, b1, w2)

    out = attention_pallas(hidden_state, encoder_outputs, w1e, w1h, b1r, w2r)
    out = jax.block_until_ready(out)

    ref = attention_ref(hidden_state, encoder_outputs, w1, b1, w2)
    assert out.shape == (B, D)
    assert jnp.allclose(out, ref, atol=1e-5, rtol=1e-5), "mismatch vs reference"

    print("KERNEL_OK")
</pallas_src>

<mosaic_0001>
module attributes {stable_mosaic.version = 11 : i64} {
  func.func @attention_kernel(%arg0: i32, %arg1: memref<2x8x32xf32, #tpu.memory_space<vmem>>, %arg2: memref<2x32xf32, #tpu.memory_space<vmem>>, %arg3: memref<32x32xf32, #tpu.memory_space<vmem>>, %arg4: memref<32x32xf32, #tpu.memory_space<vmem>>, %arg5: memref<1x32xf32, #tpu.memory_space<vmem>>, %arg6: memref<1x32xf32, #tpu.memory_space<vmem>>, %arg7: memref<2x32xf32, #tpu.memory_space<vmem>>) attributes {dimension_semantics = [#tpu.dimension_semantics<parallel>], iteration_bounds = array<i64: 1>, scalar_prefetch = 0 : i64, scratch_operands = 0 : i64, tpu.core_type = #tpu.core_type<tc>, window_params = [{transform_indices = @transform_0, window_bounds = array<i64: 2, 8, 32>}, {transform_indices = @transform_1, window_bounds = array<i64: 2, 32>}, {pipeline_mode = #tpu.pipeline_mode<synchronous>, transform_indices = @transform_2, window_bounds = array<i64: 32, 32>}, {pipeline_mode = #tpu.pipeline_mode<synchronous>, transform_indices = @transform_3, window_bounds = array<i64: 32, 32>}, {pipeline_mode = #tpu.pipeline_mode<synchronous>, transform_indices = @transform_4, window_bounds = array<i64: 1, 32>}, {pipeline_mode = #tpu.pipeline_mode<synchronous>, transform_indices = @transform_5, window_bounds = array<i64: 1, 32>}, {transform_indices = @transform_6, window_bounds = array<i64: 2, 32>}]} {
    %c0 = arith.constant 0 : index
    %c0_0 = arith.constant 0 : index
    %c0_1 = arith.constant 0 : index
    %0 = vector.load %arg1[%c0, %c0_0, %c0_1] : memref<2x8x32xf32, #tpu.memory_space<vmem>>, vector<2x8x32xf32>
    %1 = vector.shape_cast %0 : vector<2x8x32xf32> to vector<16x32xf32>
    %c0_2 = arith.constant 0 : index
    %c0_3 = arith.constant 0 : index
    %2 = vector.load %arg3[%c0_2, %c0_3] : memref<32x32xf32, #tpu.memory_space<vmem>>, vector<32x32xf32>
    %cst = arith.constant dense<0.000000e+00> : vector<16x32xf32>
    %3 = tpu.matmul %1, %2, %cst {dimension_numbers = #tpu.dot_dimension_numbers<[1], [0], [0], [1], [0, 0, 1, 1], [], []>} : vector<16x32xf32>, vector<32x32xf32>, vector<16x32xf32> -> vector<16x32xf32>
    %c0_4 = arith.constant 0 : index
    %c0_5 = arith.constant 0 : index
    %4 = vector.load %arg2[%c0_4, %c0_5] : memref<2x32xf32, #tpu.memory_space<vmem>>, vector<2x32xf32>
    %c0_6 = arith.constant 0 : index
    %c0_7 = arith.constant 0 : index
    %5 = vector.load %arg4[%c0_6, %c0_7] : memref<32x32xf32, #tpu.memory_space<vmem>>, vector<32x32xf32>
    %cst_8 = arith.constant dense<0.000000e+00> : vector<2x32xf32>
    %6 = tpu.matmul %4, %5, %cst_8 {dimension_numbers = #tpu.dot_dimension_numbers<[1], [0], [0], [1], [0, 0, 1, 1], [], []>} : vector<2x32xf32>, vector<32x32xf32>, vector<2x32xf32> -> vector<2x32xf32>
    %c0_9 = arith.constant 0 : index
    %c0_10 = arith.constant 0 : index
    %7 = vector.load %arg5[%c0_9, %c0_10] : memref<1x32xf32, #tpu.memory_space<vmem>>, vector<1x32xf32>
    %8 = vector.broadcast %7 : vector<1x32xf32> to vector<2x32xf32>
    %9 = arith.addf %6, %8 : vector<2x32xf32>
    %10 = vector.shape_cast %3 : vector<16x32xf32> to vector<2x8x32xf32>
    %11 = vector.shape_cast %9 : vector<2x32xf32> to vector<2x1x32xf32>
    %12 = vector.broadcast %11 : vector<2x1x32xf32> to vector<2x8x32xf32>
    %13 = arith.addf %10, %12 : vector<2x8x32xf32>
    %14 = math.tanh %13 : vector<2x8x32xf32>
    %c0_11 = arith.constant 0 : index
    %c0_12 = arith.constant 0 : index
    %15 = vector.load %arg6[%c0_11, %c0_12] : memref<1x32xf32, #tpu.memory_space<vmem>>, vector<1x32xf32>
    %16 = vector.shape_cast %15 : vector<1x32xf32> to vector<1x1x32xf32>
    %17 = vector.broadcast %16 : vector<1x1x32xf32> to vector<2x8x32xf32>
    %18 = arith.mulf %14, %17 : vector<2x8x32xf32>
    %cst_13 = arith.constant dense<0.000000e+00> : vector<2x8xf32>
    %19 = vector.multi_reduction <add>, %18, %cst_13 [2] : vector<2x8x32xf32> to vector<2x8xf32>
    %cst_14 = arith.constant dense<0xFF800000> : vector<2xf32>
    %20 = vector.multi_reduction <maximumf>, %19, %cst_14 [1] : vector<2x8xf32> to vector<2xf32>
    %21 = vector.shape_cast %20 : vector<2xf32> to vector<2x1xf32>
    %22 = vector.broadcast %21 : vector<2x1xf32> to vector<2x8xf32>
    %23 = arith.subf %19, %22 : vector<2x8xf32>
    %24 = math.exp %23 : vector<2x8xf32>
    %cst_15 = arith.constant dense<0.000000e+00> : vector<2xf32>
    %25 = vector.multi_reduction <add>, %24, %cst_15 [1] : vector<2x8xf32> to vector<2xf32>
    %26 = vector.shape_cast %25 : vector<2xf32> to vector<2x1xf32>
    %27 = tpu.reciprocal %26 : vector<2x1xf32> -> vector<2x1xf32>
    %28 = vector.shape_cast %24 : vector<2x8xf32> to vector<2x1x8xf32>
    "tpu.trace_start"() <{level = 10 : i32, message = "bqs,bsd->bqd"}> : () -> ()
    %cst_16 = arith.constant dense<0.000000e+00> : vector<2x1x32xf32>
    %29 = tpu.matmul %28, %0, %cst_16 {dimension_numbers = #tpu.dot_dimension_numbers<[2], [1], [1], [2], [0, 0, 0, 1, 1, 2], [0], [0]>} : vector<2x1x8xf32>, vector<2x8x32xf32>, vector<2x1x32xf32> -> vector<2x1x32xf32>
    "tpu.trace_stop"() : () -> ()
    %30 = vector.shape_cast %29 : vector<2x1x32xf32> to vector<2x32xf32>
    %31 = vector.broadcast %27 : vector<2x1xf32> to vector<2x32xf32>
    %32 = arith.mulf %30, %31 : vector<2x32xf32>
    %c0_17 = arith.constant 0 : index
    %c0_18 = arith.constant 0 : index
    %33 = vector.load %arg7[%c0_17, %c0_18] : memref<2x32xf32, #tpu.memory_space<vmem>>, vector<2x32xf32>
    tpu.vector_store %arg7[%c0_17, %c0_18], %32 {strides = array<i32>} : memref<2x32xf32, #tpu.memory_space<vmem>>, vector<2x32xf32>,
    return
  }
  func.func @transform_0(%arg0: i32) -> (i32, i32, i32) {
    %c0_i32 = arith.constant 0 : i32
    %c0_i32_0 = arith.constant 0 : i32
    %c0_i32_1 = arith.constant 0 : i32
    return %arg0, %c0_i32, %c0_i32_0 : i32, i32, i32
  }
  func.func @transform_1(%arg0: i32) -> (i32, i32) {
    %c0_i32 = arith.constant 0 : i32
    %c0_i32_0 = arith.constant 0 : i32
    return %arg0, %c0_i32 : i32, i32
  }
  func.func @transform_2(%arg0: i32) -> (i32, i32) {
    %c0_i32 = arith.constant 0 : i32
    %c0_i32_0 = arith.constant 0 : i32
    %c0_i32_1 = arith.constant 0 : i32
    return %c0_i32, %c0_i32_0 : i32, i32
  }
  func.func @transform_3(%arg0: i32) -> (i32, i32) {
    %c0_i32 = arith.constant 0 : i32
    %c0_i32_0 = arith.constant 0 : i32
    %c0_i32_1 = arith.constant 0 : i32
    return %c0_i32, %c0_i32_0 : i32, i32
  }
  func.func @transform_4(%arg0: i32) -> (i32, i32) {
    %c0_i32 = arith.constant 0 : i32
    %c0_i32_0 = arith.constant 0 : i32
    %c0_i32_1 = arith.constant 0 : i32
    return %c0_i32, %c0_i32_0 : i32, i32
  }
  func.func @transform_5(%arg0: i32) -> (i32, i32) {
    %c0_i32 = arith.constant 0 : i32
    %c0_i32_0 = arith.constant 0 : i32
    %c0_i32_1 = arith.constant 0 : i32
    return %c0_i32, %c0_i32_0 : i32, i32
  }
  func.func @transform_6(%arg0: i32) -> (i32, i32) {
    %c0_i32 = arith.constant 0 : i32
    %c0_i32_0 = arith.constant 0 : i32
    return %arg0, %c0_i32 : i32, i32
  }
}

</mosaic_0001>

<bundles_post_ra>
// kernel: tpu_custom_call.1
= control target key start
LH: loop header
LB: loop body
LE: loop exit
PB: predicated region body
PF: predicated region fallthrough
CT: control target
= control target key end

     0   :  { %11 = vsyncpa [#allocation3], 0  ;;  %s839_s0 = inlined_call_operand.hbm [shape: f32[2,8,32], index: 0, kind: input, shape index: {}]   ;;  %s840_s1 = inlined_call_operand.vmem [shape: f32[2,32], index: 1, kind: input, shape index: {}]   ;;  %s841_s2 = inlined_call_operand.hbm [shape: f32[32,32], index: 2, kind: input, shape index: {}]   ;;  %s842_s3 = inlined_call_operand.hbm [shape: f32[32,32], index: 3, kind: input, shape index: {}]   ;;  %s843_s4 = inlined_call_operand.vmem [shape: f32[1,32], index: 4, kind: input, shape index: {}]   ;;  %s844_s5 = inlined_call_operand.vmem [shape: f32[1,32], index: 5, kind: input, shape index: {}]   ;;  %s845_s6 = inlined_call_operand.hbm [shape: f32[2,32], index: 6, kind: output, shape index: {}]  }
   0x1   :  { %12 = vsyncpa [#allocation6], 0 }
   0x2   :  { %13 = vsyncpa [#allocation4], 0  ;;  %s707_s21 = smov [#allocation5]   ;;  %s708_s23 = smov [#allocation2]  }
   0x3   :  { %s33_s22 = sshll.u32 %s707_s21, 4  ;;  %s19_s24 = sshll.u32 %s708_s23, 4  ;;  %s34_s22 = int_to_ptr.vmem [resolvable:$true] %s33_s22  ;;  %s753_s24 = int_to_ptr.vmem [resolvable:$true] %s19_s24 }
   0x4   :  { %s613_s27 = scalar_lea.hbm %s841_s2, 512 }
   0x5   :  { %p614_p0 = scmp.ne.s32.totalorder %s841_s2, %s613_s27  ;;  %p617_p1 = scmp.lt.u32.totalorder %s613_s27, %s841_s2 }
   0x7   :  { %p619_p2 = pnand %p617_p1, %p614_p0 }
   0x9   :  { %622 = shalt.err (!%p619_p2)
}
   0xa   :  { %s623_s8 = scalar_lea.vmem %s34_s22, 512  ;;  %p628_p4 = scmp.lt.s32.totalorder %s34_s22, %s34_s22 }
   0xb   :  { %p624_p3 = scmp.ne.s32.totalorder %s34_s22, %s623_s8  ;;  %p629_p5 = scmp.lt.s32.totalorder %s623_s8, %s623_s8 }
   0xd   :  { %p630_p6 = por %p629_p5, %p628_p4 }
   0xf   :  { %p631_p7 = pnand %p630_p6, %p624_p3 }
  0x11   :  { %634 = shalt.err (!%p631_p7)
}
  0x12   :  { %s709_s9 = smov 128   ;;  %s710_s10 = smov 8  }
  0x13   :  { %39 = dma.hbm_to_vmem [thread:$0]  %s841_s2, 512, %s34_s22, [#allocation6], %s709_s9, %s709_s9, %s710_s10  }
  0x14   :  { %s635_s15 = scalar_lea.hbm %s839_s0, 256 }
  0x15   :  { %p636_p8 = scmp.ne.s32.totalorder %s839_s0, %s635_s15  ;;  %p639_p9 = scmp.lt.u32.totalorder %s635_s15, %s839_s0 }
  0x17   :  { %p641_p10 = pnand %p639_p9, %p636_p8 }
  0x19   :  { %644 = shalt.err (!%p641_p10)
}
  0x1a   :  { %s645_s20 = scalar_lea.vmem %s753_s24, 256  ;;  %p650_p12 = scmp.lt.s32.totalorder %s753_s24, %s753_s24 }
  0x1b   :  { %p646_p11 = scmp.ne.s32.totalorder %s753_s24, %s645_s20  ;;  %p651_p13 = scmp.lt.s32.totalorder %s645_s20, %s645_s20 }
  0x1d   :  { %p652_p0 = por %p651_p13, %p650_p12 }
  0x1f   :  { %p653_p1 = pnand %p652_p0, %p646_p11 }
  0x21   :  { %656 = shalt.err (!%p653_p1)
}
  0x22   :  { %25 = dma.hbm_to_vmem [thread:$0]  %s839_s0, 256, %s753_s24, [#allocation3], %s709_s9, %s709_s9, %s710_s10  }
  0x23   :  { %s711_s22 = smov [#allocation7]   ;;  %s657_s27 = scalar_lea.hbm %s842_s3, 512 }
  0x24   :  { %s45_s23 = sshll.u32 %s711_s22, 4  ;;  %p658_p2 = scmp.ne.s32.totalorder %s842_s3, %s657_s27  ;;  %s46_s23 = int_to_ptr.vmem [resolvable:$true] %s45_s23 }
  0x25   :  { %p661_p3 = scmp.lt.u32.totalorder %s657_s27, %s842_s3 }
  0x27   :  { %p663_p4 = pnand %p661_p3, %p658_p2 }
  0x29   :  { %666 = shalt.err (!%p663_p4)
}
  0x2a   :  { %s667_s8 = scalar_lea.vmem %s46_s23, 512  ;;  %p672_p6 = scmp.lt.s32.totalorder %s46_s23, %s46_s23 }
  0x2b   :  { %p668_p5 = scmp.ne.s32.totalorder %s46_s23, %s667_s8  ;;  %p673_p7 = scmp.lt.s32.totalorder %s667_s8, %s667_s8 }
  0x2d   :  { %p674_p8 = por %p673_p7, %p672_p6 }
  0x2f   :  { %p675_p9 = pnand %p674_p8, %p668_p5 }
  0x31   :  { %678 = shalt.err (!%p675_p9)
}
  0x32   :  { %51 = dma.hbm_to_vmem [thread:$0]  %s842_s3, 512, %s46_s23, [#allocation6], %s709_s9, %s709_s9, %s710_s10  }
  0x33   :  { %701 = dma.done.wait [#allocation3], 256  }
  0x34   :  { %702 = vsyncadd [#allocation3], 4294967040 }
  0x35   :  { %703 = dma.done.wait [#allocation6], 1024  }
  0x36   :  { %704 = vsyncadd [#allocation6], 4294966272  ;;  %v712_v0 = vmov 0.0|0.0   ;;  %vm713_vm0 = vmmov 0   ;;  %v714_v1 = vmov 0.0   ;;  %v154_v2 = vld [vmem:[#allocation7] sm:$0xff]  ;;  %v242_v19 = vlaneseq }
  0x37   :  { %584 = vmatprep.subr.bf16.mxu1 %v712_v0  ;;  %563 = vmatprep.mubr.msk.f32.mxu1 %vm713_vm0, %v714_v1  ;;  %v155_v3 = vld [vmem:[#allocation7 + $0x8] sm:$0xff]  ;;  %v156_v4 = vld [vmem:[#allocation7 + $0x10] sm:$0xff]  ;;  %v157_v6 = vld [vmem:[#allocation7 + $0x18] sm:$0xff]  ;;  %vm71_vm1 = vcmask 261120   ;;  %v715_v17 = vmov 1966171168  }
  0x38   :  { %v585_v5 = vpack.c.bf16 %v155_v3, %v154_v2  ;;  %v67_v7 = vld [vmem:[#allocation5] sm:$0xff]  ;;  %v68_v8 = vld [vmem:[#allocation5 + $0x8] sm:$0xff]  ;;  %v69_v10 = vld [vmem:[#allocation5 + $0x10] sm:$0xff]  ;;  %v588_v12 = vpack.c.bf16 %v157_v6, %v156_v4  ;;  %v240_v18 = vunpack.c.l.s4 %v715_v17  ;;  %v243_v21 = vshrl.u32 %v242_v19, 7 }
  0x39   :  { %v576_v9 = vpack.c.bf16 %v68_v8, %v67_v7  ;;  %v70_v11 = vld [vmem:[#allocation5 + $0x18] sm:$0xff]  ;;  %v65_v14 = vld [vmem:[#allocation2] sm:$0xff]  ;;  %v293_v45 = vand.u32 127, %v242_v19  ;;  %vm302_vm2 = vcmask 1041409   ;;  %vm305_vm3 = vcmask 58368  }
  0x3a   :  { %586 = vmatpush3.bf16.msra.mxu1 %v585_v5  ;;  %v580_v13 = vpack.c.bf16 %v70_v11, %v69_v10  ;;  %552 = vmatprep.mubr.msk.f32.mxu0 %vm71_vm1, %v65_v14  ;;  %v153_v15 = vld [vmem:[%s840_s1] sm:$0x3]  ;;  %v66_v16 = vld [vmem:[#allocation2 + $0x8] sm:$0xff]  ;;  %v241_v20 = vunpack.c.0.s8 %v240_v18  ;;  %v263_v29 = vsub.s32 0, %v243_v21  ;;  %v716_v53 = vmov 0  }
  0x3b   :  { %587 = vmatprep.subr.bf16.mxu1 %v712_v0  ;;  %577 = vmatprep.subr.bf16.mxu0 %v576_v9  ;;  %v524_v22 = vld [vmem:[%s843_s4] ss:$0 sm:$0xff]  ;;  %v296_v47 = vsub.s32 %v293_v45, %v243_v21  ;;  %v316_v54 = vsub.s32 1, %v243_v21  ;;  %vm348_vm4 = vcmask 64512   ;;  %s717_s4 = smov [#allocation8]   ;;  %vm504_vm5 = vcmask 254976  }
  0x3c   :  { %579 = vmatpush3.bf16.msra.mxu0 %v576_v9  ;;  %v244_v23 = vsub.s32 %v241_v20, %v243_v21  ;;  %v526_v38 = vld [vmem:[%s844_s5] ss:$0 sm:$0xff]  ;;  %602 = vset.pattern.permute.xlu0 %v716_v53  ;;  %s512_s5 = sshll.u32 %s717_s4, 4  ;;  %s513_s5 = int_to_ptr.vmem [resolvable:$true] %s512_s5 }
  0x3d   :  { %581 = vmatprep.subr.bf16.mxu0 %v580_v13  ;;  %601 = vset.pattern.permute.xlu1 %v716_v53  ;;  %s679_s13 = scalar_lea.vmem %s513_s5, 32  ;;  %p684_p11 = scmp.lt.s32.totalorder %s513_s5, %s513_s5 }
  0x3e   :  { %589 = vmatpush3.bf16.msra.mxu1 %v588_v12  ;;  %p680_p10 = scmp.ne.s32.totalorder %s513_s5, %s679_s13  ;;  %p685_p12 = scmp.lt.s32.totalorder %s679_s13, %s679_s13 }
  0x3f   :  { %571 = vmatprep.subr.mxu1 %v714_v1 }
  0x40   :  { %583 = vmatpush3.bf16.msra.mxu0 %v580_v13  ;;  %p686_p13 = por %p685_p12, %p684_p11 }
  0x41   :  { %564 = vmatmul.mubr.msk.f32.vlgmr.msra.gmra.mrb[0].mxu1 %vm71_vm1, %v153_v15  ;;  %566 = vmatprep.subr.mxu0 %v714_v1 }
  0x42   :  { %572 = vmatpush3.msra.mxu1 %v66_v16  ;;  %573 = vmatprep.mubr.msk.f32.mxu1 %vm713_vm0, %v714_v1  ;;  %p687_p0 = pnand %p686_p13, %p680_p10 }
  0x43   :  { %553 = vmatmul.mubr.msk.f32.vlgmr.msra.gmra.mrb[0].mxu0 %vm71_vm1, %v66_v16 }
  0x44   :  { %567 = vmatpush3.msra.mxu0 %v65_v14  ;;  %568 = vmatprep.mubr.msk.f32.mxu0 %vm713_vm0, %v714_v1 }
 0x114   :  { %v234_v24 = vpop.f32.mrb[0].mxu1 }
 0x115   :  { %v235_v25 = vadd.f32 %v524_v22, %v234_v24  ;;  %v565_v26 = vpop.f32.mrb[1].mxu1 }
 0x116   :  { %v554_v27 = vpop.f32.mrb[0].mxu0 }
 0x117   :  { %v245_v28 = vrot.slane %v235_v25, %v244_v23  ;;  %v144_v30 = vpop.f32.mrb[1].mxu0 }
 0x119   :  { %v246_v31 = vcombine.high %v245_v28, %v245_v28  ;;  %v253_v32 = vrot.slane %v245_v28, %v244_v23 }
 0x11b   :  { %v260_v33 = vrot.slane %v246_v31, %v244_v23  ;;  %v264_v34 = vrot.slane %v253_v32, %v263_v29 }
 0x11d   :  { %v268_v35 = vrot.slane %v260_v33, %v263_v29  ;;  %v271_v36 = vadd.f32 %v264_v34, %v144_v30 }
 0x11f   :  { %v272_v37 = vadd.f32 %v554_v27, %v268_v35  ;;  %603 = vtanh.f32 %v271_v36 }
 0x121   :  { %605 = vtanh.f32 %v272_v37 }
 0x129   :  { %v604_v39 = vpop.eup %603 }
 0x12a   :  { %v282_v40 = vmul.f32 %v604_v39, %v526_v38 }
 0x12b   :  { %v606_v41 = vpop.eup %605 }
 0x12c   :  { %v284_v42 = vsel %vm71_vm1, %v282_v40, 0.0  ;;  %v283_v43 = vmul.f32 %v606_v41, %v526_v38 }
 0x12d   :  { %285 = vadd.xlane.f32.xlu0 %v284_v42 }
 0x12e   :  { %v287_v44 = vsel %vm71_vm1, %v283_v43, 0.0 }
 0x131   :  { %288 = vadd.xlane.f32.xlu0 %v287_v44 }
 0x1ba   :  { %v286_v46 = vpop.xlane.xlu0 %285 }
 0x1bb   :  { %v297_v49 = vrot.slane %v286_v46, %v296_v47 }
 0x1be   :  { %v289_v48 = vpop.xlane.xlu0 %288 }
 0x1bf   :  { %v301_v50 = vrot.slane %v289_v48, %v296_v47 }
 0x1c1   :  { %v303_v51 = vsel %vm302_vm2, %v301_v50, %v297_v49 }
 0x1c2   :  { %v306_v52 = vsel %vm305_vm3, %v303_v51, -inf }
 0x1c3   :  { %307 = vmax.xlane.f32.xlu1 %v306_v52 }
 0x250   :  { %v308_v55 = vpop.xlane.xlu1 %307 }
 0x251   :  { %v313_v56 = vrot.slane %v308_v55, %v263_v29  ;;  %v317_v57 = vrot.slane %v308_v55, %v316_v54 }
 0x253   :  { %v320_v58 = vsub.f32 %v286_v46, %v313_v56  ;;  %v321_v59 = vsub.f32 %v289_v48, %v317_v57 }
 0x255   :  { %v322_v60 = vmul.f32 1.442695, %v320_v58  ;;  %v324_v61 = vmul.f32 1.442695, %v321_v59 }
 0x257   :  { %607 = vpow2.f32 %v322_v60 }
 0x258   :  { %609 = vpow2.f32 %v324_v61 }
 0x261   :  { %v608_v62 = vpop.eup %607 }
 0x262   :  { %v610_v63 = vpop.eup %609  ;;  %329 = vperm.xlu0 %602, %v608_v62  }
 0x263   :  { %332 = vperm.xlu1 %601, %v610_v63  }
 0x2e1   :  { %v330_v0 = vpop.permute.xlu0 %329 }
 0x2e2   :  { %v333_v1 = vpop.permute.xlu1 %332  ;;  %v337_v2 = vrot.slane %v330_v0, %v296_v47 }
 0x2e3   :  { %v341_v3 = vrot.slane %v333_v1, %v296_v47 }
 0x2e4   :  { %569 = vmatmul.mubr.msk.f32.vlgmr.msra.gmra.mrb[2].mxu0 %vm348_vm4, %v337_v2 }
 0x2e5   :  { %574 = vmatmul.mubr.msk.f32.vlgmr.msra.gmra.mrb[2].mxu1 %vm348_vm4, %v341_v3  ;;  %v342_v4 = vsel %vm302_vm2, %v341_v3, %v337_v2 }
 0x2e6   :  { %v344_v5 = vsel %vm305_vm3, %v342_v4, 0.0 }
 0x2e7   :  { %345 = vadd.xlane.f32.xlu1 %v344_v5 }
 0x374   :  { %v346_v6 = vpop.xlane.xlu1 %345 }
 0x375   :  { %611 = vrcp.f32 %v346_v6 }
 0x37f   :  { %v612_v7 = vpop.eup %611 }
 0x380   :  { %v494_v9 = vrot.slane %v612_v7, 1 }
 0x3b7   :  { %v417_v8 = vpop.f32.mrb[2].mxu0 }
 0x3b8   :  { %v489_v10 = vpop.f32.mrb[2].mxu1  ;;  %v570_v11 = vpop.f32.mrb[3].mxu0  ;;  %v497_v14 = vmul.f32 %v612_v7, %v417_v8 }
 0x3b9   :  { %v498_v12 = vmul.f32 %v494_v9, %v489_v10  ;;  %v575_v13 = vpop.f32.mrb[3].mxu1 }
 0x3bb   :  { %v501_v15 = vrot.slane %v498_v12, 7 }
 0x3bd   :  { %v502_v16 = vsel %vm302_vm2, %v501_v15, %v497_v14 }
 0x3be   :  { %505 = vst.msk [vmem:[#allocation8] sm:$0x3] %vm504_vm5, %v502_v16 }
 0x3bf   :  { %690 = shalt.err (!%p687_p0)
}
 0x3c0   :  { %s691_s16 = scalar_lea.hbm %s845_s6, 32 }
 0x3c1   :  { %p692_p1 = scmp.ne.s32.totalorder %s845_s6, %s691_s16  ;;  %p695_p2 = scmp.lt.u32.totalorder %s691_s16, %s845_s6 }
 0x3c3   :  { %p697_p3 = pnand %p695_p2, %p692_p1 }
 0x3c5   :  { %700 = shalt.err (!%p697_p3)
}
 0x3c6   :  { %515 = dma.vmem_to_hbm [thread:$0]  %s513_s5, 32, %s845_s6, [#allocation4]  }
 0x3c7   :  { %705 = dma.done.wait [#allocation4], 32  }
 0x3c8   :  { %706 = vsyncadd [#allocation4], 4294967264 }
 0x3c9   :  { %519 = vsyncpa [#allocation3], 1 }
 0x3ca   :  { %520 = vsyncpa [#allocation6], 1 }
 0x3cb   :  { %521 = vsyncpa [#allocation4], 1 }

</bundles_post_ra>
